<compile_context>
chip_gen: v6e
topology: v6e:2x2x1
jax: 0.10.0
libtpu: 0.0.40
codegen_flags: <defaults>
</compile_context>

<pallas_src>
import functools

import jax
import jax.numpy as jnp
from jax.experimental import pallas as pl
from jax.experimental.pallas import tpu as pltpu


def _shift_cols(x, offset):
    """y[..., c] = x[..., c + offset] with zeros where c + offset is outside [0, W)."""
    w = x.shape[-1]
    if w % 128 == 0 and w >= 128:
        # Lane-aligned width: do the shift as an XLU rotate + edge mask
        # (keeps the VALU / vector-load slots free).
        y = pltpu.roll(x, shift=(-offset) % w, axis=x.ndim - 1)
        col = jax.lax.broadcasted_iota(jnp.int32, x.shape, x.ndim - 1)
        keep = jnp.logical_and(col + offset >= 0, col + offset < w)
        return jnp.where(keep, y, 0.0)
    # General width: slice + zero-column concat (offset is always +-1 here).
    zcol = jnp.zeros(x.shape[:-1] + (1,), x.dtype)
    if offset > 0:
        return jnp.concatenate([x[..., 1:], zcol], axis=-1)
    return jnp.concatenate([zcol, x[..., :-1]], axis=-1)


def _excl_loss_kernel(f_ref, fa_ref, fb_ref, b_ref, ba_ref, bb_ref, out_ref,
                      *, img_h):
    # f_ref / b_ref   : (1, C, tH, W)   main H tile (native dtype, cast here)
    # fa_ref / ba_ref : (1, 1, C, W)    row just above the tile (zero at image top)
    # fb_ref / bb_ref : (1, 1, C, W)    row just below the tile (zero at image bottom)
    # out_ref         : (1, 1, 8, 128)  lane-dense per-block partial sum
    hi = pl.program_id(1)
    c_dim = f_ref.shape[1]
    t_h = f_ref.shape[2]
    w = f_ref.shape[3]

    ragged = (img_h % t_h) != 0
    if ragged:
        row = jax.lax.broadcasted_iota(jnp.int32, (t_h, w), 0) + hi * t_h
        valid = row < img_h  # rows past the image bottom (last, partial tile)

    def channel_sum_main(ref):
        # Unrolled loop over C: live working set stays ~(tH, W) per step.
        acc = ref[0, 0].astype(jnp.float32)
        for c in range(1, c_dim):
            acc = acc + ref[0, c].astype(jnp.float32)
        if ragged:
            acc = jnp.where(valid, acc, 0.0)  # out-of-image rows -> zero pad
        return acc

    def channel_sum_halo(ref):
        return jnp.sum(ref[0, 0].astype(jnp.float32), axis=0, keepdims=True)  # (1, W)

    def sobel(xs, top, bot):
        # xs: (tH, W) channel-summed rows of this tile; top/bot: +-1 halo rows.
        ext = jnp.concatenate([top, xs, bot], axis=0)                 # (tH+2, W)
        # kx = [[1,0,-1],[2,0,-2],[1,0,-1]]: smooth along H, diff along W.
        ty = ext[:-2] + 2.0 * ext[1:-1] + ext[2:]                     # (tH, W)
        gx = _shift_cols(ty, -1) - _shift_cols(ty, +1)
        # ky = [[1,2,1],[0,0,0],[-1,-2,-1]]: smooth along W, diff along H.
        tx = _shift_cols(ext, -1) + 2.0 * ext + _shift_cols(ext, +1)  # (tH+2, W)
        gy = tx[:-2] - tx[2:]                                         # (tH, W)
        return gx, gy

    f_gx, f_gy = sobel(channel_sum_main(f_ref),
                       channel_sum_halo(fa_ref), channel_sum_halo(fb_ref))
    b_gx, b_gy = sobel(channel_sum_main(b_ref),
                       channel_sum_halo(ba_ref), channel_sum_halo(bb_ref))

    prod = jnp.abs(f_gx) * jnp.abs(b_gx) + jnp.abs(f_gy) * jnp.abs(b_gy)
    if ragged:
        prod = jnp.where(valid, prod, 0.0)

    # Lane-dense (8, 128) store of the block's partial sum (broadcast); the
    # wrapper picks element [0, 0] of each block and finishes the reduction.
    out_ref[...] = jnp.full(out_ref.shape, jnp.sum(prod), dtype=jnp.float32)


def _round_tile_h(h, requested):
    t = min(int(requested), h)
    if t < h:
        t = max((t // 8) * 8, 8)  # keep the sublane block dim 8-aligned
    return min(t, h)


def _pick_tile_h(h, w, c, itemsize, vmem_budget_bytes=12 * 1024 * 1024):
    # Per grid step: 2 inputs x 2 pipeline buffers x (C * tH * W * itemsize)
    # for the main tiles plus ~10 tile-sized f32 intermediates in-kernel.
    # 12 MiB budget (+ 48 MiB scoped limit below) fits v5e/v6e and v7x's
    # halved 64 MiB physical VMEM.
    per_row = w * (4 * c * itemsize + 10 * 4)
    return _round_tile_h(h, max(vmem_budget_bytes // per_row, 8))


def excl_loss(f_pred, b_pred, *, channels=3, loss_weight=1.0, tile_h=None):
    """Pallas TPU implementation of ExclLoss.forward (NCHW inputs, any float dtype)."""
    assert f_pred.shape == b_pred.shape
    n, c, h, w = f_pred.shape
    assert c == channels, "input channel count must match module `channels`"

    itemsize = jnp.dtype(f_pred.dtype).itemsize
    t_h = _pick_tile_h(h, w, c, itemsize) if tile_h is None else _round_tile_h(h, tile_h)
    n_h = pl.cdiv(h, t_h)

    def make_halos(x):
        # Row i*tH - 1 ("above") and row (i+1)*tH ("below") for every H tile,
        # zero-filled at the image top/bottom: reproduces the conv's zero
        # padding with ~2*nH rows of traffic instead of a padded image copy.
        zero_row = jnp.zeros((n, c, 1, w), x.dtype)
        above = x[:, :, t_h - 1:(n_h - 1) * t_h:t_h, :]
        below = x[:, :, t_h:(n_h - 1) * t_h + 1:t_h, :]
        above = jnp.concatenate([zero_row, above], axis=2)       # (N, C, nH, W)
        below = jnp.concatenate([below, zero_row], axis=2)
        # Tile axis goes in front of (C, W) so the block's last two dims are full.
        return (jnp.transpose(above, (0, 2, 1, 3)),
                jnp.transpose(below, (0, 2, 1, 3)))              # (N, nH, C, W)

    f_above, f_below = make_halos(f_pred)
    b_above, b_below = make_halos(b_pred)

    main_spec = pl.BlockSpec((1, c, t_h, w), lambda ni, hi: (ni, 0, hi, 0))
    halo_spec = pl.BlockSpec((1, 1, c, w), lambda ni, hi: (ni, hi, 0, 0))
    out_spec = pl.BlockSpec((1, 1, 8, 128), lambda ni, hi: (ni, hi, 0, 0))

    partial = pl.pallas_call(
        functools.partial(_excl_loss_kernel, img_h=h),
        out_shape=jax.ShapeDtypeStruct((n, n_h, 8, 128), jnp.float32),
        grid=(n, n_h),
        in_specs=[main_spec, halo_spec, halo_spec,
                  main_spec, halo_spec, halo_spec],
        out_specs=out_spec,
        compiler_params=pltpu.CompilerParams(
            dimension_semantics=("parallel", "parallel"),
            vmem_limit_bytes=48 * 1024 * 1024),
        cost_estimate=pl.CostEstimate(
            flops=22 * n * c * h * w,
            transcendentals=0,
            bytes_accessed=2 * n * c * h * w * itemsize + n * n_h * 8 * 128 * 4),
    )(f_pred, f_above, f_below, b_pred, b_above, b_below)

    return jnp.sum(partial[:, :, 0, 0]) * jnp.asarray(loss_weight, jnp.float32)


def _reference_excl_loss(f_pred, b_pred, channels, loss_weight):
    """Pure-JAX reference mirroring the PyTorch module (via real convs)."""
    kx = jnp.array([[1., 0., -1.], [2., 0., -2.], [1., 0., -1.]],
                   jnp.float32).reshape(1, 1, 3, 3)
    kx = jnp.tile(kx, (1, channels, 1, 1))
    ky = jnp.array([[1., 2., 1.], [0., 0., 0.], [-1., -2., -1.]],
                   jnp.float32).reshape(1, 1, 3, 3)
    ky = jnp.tile(ky, (1, channels, 1, 1))
    dn = jax.lax.conv_dimension_numbers(f_pred.shape, kx.shape,
                                        ('NCHW', 'OIHW', 'NCHW'))
    conv = lambda x, k: jax.lax.conv_general_dilated(
        x, k, (1, 1), ((1, 1), (1, 1)), dimension_numbers=dn)
    f_gx, f_gy = conv(f_pred, kx), conv(f_pred, ky)
    b_gx, b_gy = conv(b_pred, kx), conv(b_pred, ky)
    loss = (jnp.sum(jnp.abs(b_gx) * jnp.abs(f_gx))
            + jnp.sum(jnp.abs(b_gy) * jnp.abs(f_gy)))
    return loss * loss_weight


if __name__ == "__main__":
    key = jax.random.PRNGKey(0)
    k1, k2, k3, k4 = jax.random.split(key, 4)

    # Case 1: module-default channels=3, small image, single H tile.
    n, c, h, w = 2, 3, 16, 16
    f1 = jax.random.normal(k1, (n, c, h, w), jnp.float32)
    b1 = jax.random.normal(k2, (n, c, h, w), jnp.float32)
    out1 = jax.block_until_ready(excl_loss(f1, b1, channels=c, loss_weight=1.0))
    ref1 = _reference_excl_loss(f1, b1, c, 1.0)
    assert jnp.allclose(out1, ref1, rtol=1e-4, atol=1e-2), (float(out1), float(ref1))

    # Case 2: multi-tile, ragged H (exercises halo rows + bottom masking + loss_weight).
    n, c, h, w = 2, 3, 40, 64
    f2 = jax.random.normal(k3, (n, c, h, w), jnp.float32)
    b2 = jax.random.normal(k4, (n, c, h, w), jnp.float32)
    out2 = jax.block_until_ready(
        excl_loss(f2, b2, channels=c, loss_weight=0.5, tile_h=16))
    ref2 = _reference_excl_loss(f2, b2, c, 0.5)
    assert jnp.allclose(out2, ref2, rtol=1e-4, atol=1e-2), (float(out2), float(ref2))

    print("KERNEL_OK")
</pallas_src>

<mosaic_0001>
module attributes {stable_mosaic.version = 11 : i64} {
  func.func @_excl_loss_kernel(%arg0: i32, %arg1: i32, %arg2: memref<1x3x16x16xf32, #tpu.memory_space<vmem>>, %arg3: memref<1x1x3x16xf32, #tpu.memory_space<vmem>>, %arg4: memref<1x1x3x16xf32, #tpu.memory_space<vmem>>, %arg5: memref<1x3x16x16xf32, #tpu.memory_space<vmem>>, %arg6: memref<1x1x3x16xf32, #tpu.memory_space<vmem>>, %arg7: memref<1x1x3x16xf32, #tpu.memory_space<vmem>>, %arg8: memref<1x1x8x128xf32, #tpu.memory_space<vmem>>) attributes {dimension_semantics = [#tpu.dimension_semantics<parallel>, #tpu.dimension_semantics<parallel>], iteration_bounds = array<i64: 2, 1>, scalar_prefetch = 0 : i64, scratch_operands = 0 : i64, tpu.core_type = #tpu.core_type<tc>, window_params = [{transform_indices = @transform_0, window_bounds = array<i64: 1, 3, 16, 16>}, {transform_indices = @transform_1, window_bounds = array<i64: 1, 1, 3, 16>}, {transform_indices = @transform_2, window_bounds = array<i64: 1, 1, 3, 16>}, {transform_indices = @transform_3, window_bounds = array<i64: 1, 3, 16, 16>}, {transform_indices = @transform_4, window_bounds = array<i64: 1, 1, 3, 16>}, {transform_indices = @transform_5, window_bounds = array<i64: 1, 1, 3, 16>}, {transform_indices = @transform_6, window_bounds = array<i64: 1, 1, 8, 128>}]} {
    %c0 = arith.constant 0 : index
    %c0_0 = arith.constant 0 : index
    %c0_1 = arith.constant 0 : index
    %c0_2 = arith.constant 0 : index
    %0 = vector.load %arg2[%c0, %c0_0, %c0_1, %c0_2] : memref<1x3x16x16xf32, #tpu.memory_space<vmem>>, vector<1x1x16x16xf32>
    %1 = vector.shape_cast %0 : vector<1x1x16x16xf32> to vector<16x16xf32>
    %c0_3 = arith.constant 0 : index
    %c1 = arith.constant 1 : index
    %c0_4 = arith.constant 0 : index
    %c0_5 = arith.constant 0 : index
    %2 = vector.load %arg2[%c0_3, %c1, %c0_4, %c0_5] : memref<1x3x16x16xf32, #tpu.memory_space<vmem>>, vector<1x1x16x16xf32>
    %3 = vector.shape_cast %2 : vector<1x1x16x16xf32> to vector<16x16xf32>
    %4 = arith.addf %1, %3 : vector<16x16xf32>
    %c0_6 = arith.constant 0 : index
    %c2 = arith.constant 2 : index
    %c0_7 = arith.constant 0 : index
    %c0_8 = arith.constant 0 : index
    %5 = vector.load %arg2[%c0_6, %c2, %c0_7, %c0_8] : memref<1x3x16x16xf32, #tpu.memory_space<vmem>>, vector<1x1x16x16xf32>
    %6 = vector.shape_cast %5 : vector<1x1x16x16xf32> to vector<16x16xf32>
    %7 = arith.addf %4, %6 : vector<16x16xf32>
    %c0_9 = arith.constant 0 : index
    %c0_10 = arith.constant 0 : index
    %c0_11 = arith.constant 0 : index
    %c0_12 = arith.constant 0 : index
    %8 = vector.load %arg3[%c0_9, %c0_10, %c0_11, %c0_12] : memref<1x1x3x16xf32, #tpu.memory_space<vmem>>, vector<1x1x3x16xf32>
    %9 = vector.shape_cast %8 : vector<1x1x3x16xf32> to vector<3x16xf32>
    %cst = arith.constant dense<0.000000e+00> : vector<16xf32>
    %10 = vector.multi_reduction <add>, %9, %cst [0] : vector<3x16xf32> to vector<16xf32>
    %11 = vector.shape_cast %10 : vector<16xf32> to vector<1x16xf32>
    %c0_13 = arith.constant 0 : index
    %c0_14 = arith.constant 0 : index
    %c0_15 = arith.constant 0 : index
    %c0_16 = arith.constant 0 : index
    %12 = vector.load %arg4[%c0_13, %c0_14, %c0_15, %c0_16] : memref<1x1x3x16xf32, #tpu.memory_space<vmem>>, vector<1x1x3x16xf32>
    %13 = vector.shape_cast %12 : vector<1x1x3x16xf32> to vector<3x16xf32>
    %cst_17 = arith.constant dense<0.000000e+00> : vector<16xf32>
    %14 = vector.multi_reduction <add>, %13, %cst_17 [0] : vector<3x16xf32> to vector<16xf32>
    %15 = vector.shape_cast %14 : vector<16xf32> to vector<1x16xf32>
    %16 = tpu.concatenate %11, %7, %15 in 0 : vector<1x16xf32>, vector<16x16xf32>, vector<1x16xf32> -> vector<18x16xf32>
    %17 = vector.extract_strided_slice %16 {offsets = [0, 0], sizes = [16, 16], strides = [1, 1]} : vector<18x16xf32> to vector<16x16xf32>
    %18 = vector.extract_strided_slice %16 {offsets = [1, 0], sizes = [16, 16], strides = [1, 1]} : vector<18x16xf32> to vector<16x16xf32>
    %cst_18 = arith.constant 2.000000e+00 : f32
    %19 = vector.broadcast %cst_18 : f32 to vector<16x16xf32>
    %20 = arith.mulf %19, %18 : vector<16x16xf32>
    %21 = arith.addf %17, %20 : vector<16x16xf32>
    %22 = vector.extract_strided_slice %16 {offsets = [2, 0], sizes = [16, 16], strides = [1, 1]} : vector<18x16xf32> to vector<16x16xf32>
    %23 = arith.addf %21, %22 : vector<16x16xf32>
    %cst_19 = arith.constant 0.000000e+00 : f32
    %24 = vector.broadcast %cst_19 : f32 to vector<16x1xf32>
    %25 = vector.extract_strided_slice %23 {offsets = [0, 0], sizes = [16, 15], strides = [1, 1]} : vector<16x16xf32> to vector<16x15xf32>
    %26 = tpu.concatenate %24, %25 in 1 : vector<16x1xf32>, vector<16x15xf32> -> vector<16x16xf32>
    %cst_20 = arith.constant 0.000000e+00 : f32
    %27 = vector.broadcast %cst_20 : f32 to vector<16x1xf32>
    %28 = vector.extract_strided_slice %23 {offsets = [0, 1], sizes = [16, 15], strides = [1, 1]} : vector<16x16xf32> to vector<16x15xf32>
    %29 = tpu.concatenate %28, %27 in 1 : vector<16x15xf32>, vector<16x1xf32> -> vector<16x16xf32>
    %30 = arith.subf %26, %29 : vector<16x16xf32>
    %cst_21 = arith.constant 0.000000e+00 : f32
    %31 = vector.broadcast %cst_21 : f32 to vector<18x1xf32>
    %32 = vector.extract_strided_slice %16 {offsets = [0, 0], sizes = [18, 15], strides = [1, 1]} : vector<18x16xf32> to vector<18x15xf32>
    %33 = tpu.concatenate %31, %32 in 1 : vector<18x1xf32>, vector<18x15xf32> -> vector<18x16xf32>
    %cst_22 = arith.constant 2.000000e+00 : f32
    %34 = vector.broadcast %cst_22 : f32 to vector<18x16xf32>
    %35 = arith.mulf %34, %16 : vector<18x16xf32>
    %36 = arith.addf %33, %35 : vector<18x16xf32>
    %cst_23 = arith.constant 0.000000e+00 : f32
    %37 = vector.broadcast %cst_23 : f32 to vector<18x1xf32>
    %38 = vector.extract_strided_slice %16 {offsets = [0, 1], sizes = [18, 15], strides = [1, 1]} : vector<18x16xf32> to vector<18x15xf32>
    %39 = tpu.concatenate %38, %37 in 1 : vector<18x15xf32>, vector<18x1xf32> -> vector<18x16xf32>
    %40 = arith.addf %36, %39 : vector<18x16xf32>
    %41 = vector.extract_strided_slice %40 {offsets = [0, 0], sizes = [16, 16], strides = [1, 1]} : vector<18x16xf32> to vector<16x16xf32>
    %42 = vector.extract_strided_slice %40 {offsets = [2, 0], sizes = [16, 16], strides = [1, 1]} : vector<18x16xf32> to vector<16x16xf32>
    %43 = arith.subf %41, %42 : vector<16x16xf32>
    %c0_24 = arith.constant 0 : index
    %c0_25 = arith.constant 0 : index
    %c0_26 = arith.constant 0 : index
    %c0_27 = arith.constant 0 : index
    %44 = vector.load %arg5[%c0_24, %c0_25, %c0_26, %c0_27] : memref<1x3x16x16xf32, #tpu.memory_space<vmem>>, vector<1x1x16x16xf32>
    %45 = vector.shape_cast %44 : vector<1x1x16x16xf32> to vector<16x16xf32>
    %c0_28 = arith.constant 0 : index
    %c1_29 = arith.constant 1 : index
    %c0_30 = arith.constant 0 : index
    %c0_31 = arith.constant 0 : index
    %46 = vector.load %arg5[%c0_28, %c1_29, %c0_30, %c0_31] : memref<1x3x16x16xf32, #tpu.memory_space<vmem>>, vector<1x1x16x16xf32>
    %47 = vector.shape_cast %46 : vector<1x1x16x16xf32> to vector<16x16xf32>
    %48 = arith.addf %45, %47 : vector<16x16xf32>
    %c0_32 = arith.constant 0 : index
    %c2_33 = arith.constant 2 : index
    %c0_34 = arith.constant 0 : index
    %c0_35 = arith.constant 0 : index
    %49 = vector.load %arg5[%c0_32, %c2_33, %c0_34, %c0_35] : memref<1x3x16x16xf32, #tpu.memory_space<vmem>>, vector<1x1x16x16xf32>
    %50 = vector.shape_cast %49 : vector<1x1x16x16xf32> to vector<16x16xf32>
    %51 = arith.addf %48, %50 : vector<16x16xf32>
    %c0_36 = arith.constant 0 : index
    %c0_37 = arith.constant 0 : index
    %c0_38 = arith.constant 0 : index
    %c0_39 = arith.constant 0 : index
    %52 = vector.load %arg6[%c0_36, %c0_37, %c0_38, %c0_39] : memref<1x1x3x16xf32, #tpu.memory_space<vmem>>, vector<1x1x3x16xf32>
    %53 = vector.shape_cast %52 : vector<1x1x3x16xf32> to vector<3x16xf32>
    %cst_40 = arith.constant dense<0.000000e+00> : vector<16xf32>
    %54 = vector.multi_reduction <add>, %53, %cst_40 [0] : vector<3x16xf32> to vector<16xf32>
    %55 = vector.shape_cast %54 : vector<16xf32> to vector<1x16xf32>
    %c0_41 = arith.constant 0 : index
    %c0_42 = arith.constant 0 : index
    %c0_43 = arith.constant 0 : index
    %c0_44 = arith.constant 0 : index
    %56 = vector.load %arg7[%c0_41, %c0_42, %c0_43, %c0_44] : memref<1x1x3x16xf32, #tpu.memory_space<vmem>>, vector<1x1x3x16xf32>
    %57 = vector.shape_cast %56 : vector<1x1x3x16xf32> to vector<3x16xf32>
    %cst_45 = arith.constant dense<0.000000e+00> : vector<16xf32>
    %58 = vector.multi_reduction <add>, %57, %cst_45 [0] : vector<3x16xf32> to vector<16xf32>
    %59 = vector.shape_cast %58 : vector<16xf32> to vector<1x16xf32>
    %60 = tpu.concatenate %55, %51, %59 in 0 : vector<1x16xf32>, vector<16x16xf32>, vector<1x16xf32> -> vector<18x16xf32>
    %61 = vector.extract_strided_slice %60 {offsets = [0, 0], sizes = [16, 16], strides = [1, 1]} : vector<18x16xf32> to vector<16x16xf32>
    %62 = vector.extract_strided_slice %60 {offsets = [1, 0], sizes = [16, 16], strides = [1, 1]} : vector<18x16xf32> to vector<16x16xf32>
    %cst_46 = arith.constant 2.000000e+00 : f32
    %63 = vector.broadcast %cst_46 : f32 to vector<16x16xf32>
    %64 = arith.mulf %63, %62 : vector<16x16xf32>
    %65 = arith.addf %61, %64 : vector<16x16xf32>
    %66 = vector.extract_strided_slice %60 {offsets = [2, 0], sizes = [16, 16], strides = [1, 1]} : vector<18x16xf32> to vector<16x16xf32>
    %67 = arith.addf %65, %66 : vector<16x16xf32>
    %cst_47 = arith.constant 0.000000e+00 : f32
    %68 = vector.broadcast %cst_47 : f32 to vector<16x1xf32>
    %69 = vector.extract_strided_slice %67 {offsets = [0, 0], sizes = [16, 15], strides = [1, 1]} : vector<16x16xf32> to vector<16x15xf32>
    %70 = tpu.concatenate %68, %69 in 1 : vector<16x1xf32>, vector<16x15xf32> -> vector<16x16xf32>
    %cst_48 = arith.constant 0.000000e+00 : f32
    %71 = vector.broadcast %cst_48 : f32 to vector<16x1xf32>
    %72 = vector.extract_strided_slice %67 {offsets = [0, 1], sizes = [16, 15], strides = [1, 1]} : vector<16x16xf32> to vector<16x15xf32>
    %73 = tpu.concatenate %72, %71 in 1 : vector<16x15xf32>, vector<16x1xf32> -> vector<16x16xf32>
    %74 = arith.subf %70, %73 : vector<16x16xf32>
    %cst_49 = arith.constant 0.000000e+00 : f32
    %75 = vector.broadcast %cst_49 : f32 to vector<18x1xf32>
    %76 = vector.extract_strided_slice %60 {offsets = [0, 0], sizes = [18, 15], strides = [1, 1]} : vector<18x16xf32> to vector<18x15xf32>
    %77 = tpu.concatenate %75, %76 in 1 : vector<18x1xf32>, vector<18x15xf32> -> vector<18x16xf32>
    %cst_50 = arith.constant 2.000000e+00 : f32
    %78 = vector.broadcast %cst_50 : f32 to vector<18x16xf32>
    %79 = arith.mulf %78, %60 : vector<18x16xf32>
    %80 = arith.addf %77, %79 : vector<18x16xf32>
    %cst_51 = arith.constant 0.000000e+00 : f32
    %81 = vector.broadcast %cst_51 : f32 to vector<18x1xf32>
    %82 = vector.extract_strided_slice %60 {offsets = [0, 1], sizes = [18, 15], strides = [1, 1]} : vector<18x16xf32> to vector<18x15xf32>
    %83 = tpu.concatenate %82, %81 in 1 : vector<18x15xf32>, vector<18x1xf32> -> vector<18x16xf32>
    %84 = arith.addf %80, %83 : vector<18x16xf32>
    %85 = vector.extract_strided_slice %84 {offsets = [0, 0], sizes = [16, 16], strides = [1, 1]} : vector<18x16xf32> to vector<16x16xf32>
    %86 = vector.extract_strided_slice %84 {offsets = [2, 0], sizes = [16, 16], strides = [1, 1]} : vector<18x16xf32> to vector<16x16xf32>
    %87 = arith.subf %85, %86 : vector<16x16xf32>
    %88 = math.absf %30 : vector<16x16xf32>
    %89 = math.absf %74 : vector<16x16xf32>
    %90 = arith.mulf %88, %89 : vector<16x16xf32>
    %91 = math.absf %43 : vector<16x16xf32>
    %92 = math.absf %87 : vector<16x16xf32>
    %93 = arith.mulf %91, %92 : vector<16x16xf32>
    %94 = arith.addf %90, %93 : vector<16x16xf32>
    %95 = vector.shape_cast %94 : vector<16x16xf32> to vector<1x16x16xf32>
    %cst_52 = arith.constant dense<0.000000e+00> : vector<1xf32>
    %96 = vector.multi_reduction <add>, %95, %cst_52 [1, 2] : vector<1x16x16xf32> to vector<1xf32>
    %97 = vector.shape_cast %96 : vector<1xf32> to vector<1x1x1xf32>
    %98 = vector.extract %97[0, 0, 0] : f32 from vector<1x1x1xf32>
    %99 = vector.broadcast %98 : f32 to vector<1x1x8x128xf32>
    %c0_53 = arith.constant 0 : index
    %c0_54 = arith.constant 0 : index
    %c0_55 = arith.constant 0 : index
    %c0_56 = arith.constant 0 : index
    %100 = vector.load %arg8[%c0_53, %c0_54, %c0_55, %c0_56] : memref<1x1x8x128xf32, #tpu.memory_space<vmem>>, vector<1x1x8x128xf32>
    tpu.vector_store %arg8[%c0_53, %c0_54, %c0_55, %c0_56], %99 {strides = array<i32>} : memref<1x1x8x128xf32, #tpu.memory_space<vmem>>, vector<1x1x8x128xf32>,
    return
  }
  func.func @transform_0(%arg0: i32, %arg1: i32) -> (i32, i32, i32, i32) {
    %c0_i32 = arith.constant 0 : i32
    %c0_i32_0 = arith.constant 0 : i32
    %c0_i32_1 = arith.constant 0 : i32
    return %arg0, %c0_i32, %arg1, %c0_i32_0 : i32, i32, i32, i32
  }
  func.func @transform_1(%arg0: i32, %arg1: i32) -> (i32, i32, i32, i32) {
    %c0_i32 = arith.constant 0 : i32
    %c0_i32_0 = arith.constant 0 : i32
    %c0_i32_1 = arith.constant 0 : i32
    return %arg0, %arg1, %c0_i32, %c0_i32_0 : i32, i32, i32, i32
  }
  func.func @transform_2(%arg0: i32, %arg1: i32) -> (i32, i32, i32, i32) {
    %c0_i32 = arith.constant 0 : i32
    %c0_i32_0 = arith.constant 0 : i32
    %c0_i32_1 = arith.constant 0 : i32
    return %arg0, %arg1, %c0_i32, %c0_i32_0 : i32, i32, i32, i32
  }
  func.func @transform_3(%arg0: i32, %arg1: i32) -> (i32, i32, i32, i32) {
    %c0_i32 = arith.constant 0 : i32
    %c0_i32_0 = arith.constant 0 : i32
    %c0_i32_1 = arith.constant 0 : i32
    return %arg0, %c0_i32, %arg1, %c0_i32_0 : i32, i32, i32, i32
  }
  func.func @transform_4(%arg0: i32, %arg1: i32) -> (i32, i32, i32, i32) {
    %c0_i32 = arith.constant 0 : i32
    %c0_i32_0 = arith.constant 0 : i32
    %c0_i32_1 = arith.constant 0 : i32
    return %arg0, %arg1, %c0_i32, %c0_i32_0 : i32, i32, i32, i32
  }
  func.func @transform_5(%arg0: i32, %arg1: i32) -> (i32, i32, i32, i32) {
    %c0_i32 = arith.constant 0 : i32
    %c0_i32_0 = arith.constant 0 : i32
    %c0_i32_1 = arith.constant 0 : i32
    return %arg0, %arg1, %c0_i32, %c0_i32_0 : i32, i32, i32, i32
  }
  func.func @transform_6(%arg0: i32, %arg1: i32) -> (i32, i32, i32, i32) {
    %c0_i32 = arith.constant 0 : i32
    %c0_i32_0 = arith.constant 0 : i32
    %c0_i32_1 = arith.constant 0 : i32
    return %arg0, %arg1, %c0_i32, %c0_i32_0 : i32, i32, i32, i32
  }
}

</mosaic_0001>

<bundles_post_ra>
// kernel: tpu_custom_call.1
= control target key start
LH: loop header
LB: loop body
LE: loop exit
PB: predicated region body
PF: predicated region fallthrough
CT: control target
= control target key end

     0   :  { %s1492_s0 = inlined_call_operand.hbm [shape: f32[2,3,16,16], index: 0, kind: input, shape index: {}]   ;;  %s1493_s1 = inlined_call_operand.vmem [shape: f32[2,1,3,16], index: 1, kind: input, shape index: {}]   ;;  %s1494_s2 = inlined_call_operand.vmem [shape: f32[2,1,3,16], index: 2, kind: input, shape index: {}]   ;;  %s1495_s3 = inlined_call_operand.hbm [shape: f32[2,3,16,16], index: 3, kind: input, shape index: {}]   ;;  %s1496_s4 = inlined_call_operand.vmem [shape: f32[2,1,3,16], index: 4, kind: input, shape index: {}]   ;;  %s1497_s5 = inlined_call_operand.vmem [shape: f32[2,1,3,16], index: 5, kind: input, shape index: {}]   ;;  %s1498_s6 = inlined_call_operand.hbm [shape: f32[2,1,8,128], index: 6, kind: output, shape index: {}]  }
   0x1   :  { %1502 = sst [smem:[#allocation14_spill]] %s1492_s0 }
   0x2   :  { %11 = vsyncpa [#allocation3], 0 }
   0x3   :  { %13 = vsyncpa [#allocation3 + $0x1], 0 }
   0x4   :  { %14 = vsyncpa [#allocation6], 0 }
   0x5   :  { %16 = vsyncpa [#allocation6 + $0x1], 0 }
   0x6   :  { %17 = vsyncpa [#allocation4], 0 }
   0x7   :  { %19 = vsyncpa [#allocation4 + $0x1], 0  ;;  %s1202_s21 = smov 0   ;;  %s1204_s22 = smov 0  }
   0x8   :  { %s1206_s23 = smov 0   ;;  %s1208_s24 = smov 0  }
   0x9   :  { %s1210_s25 = smov 0   ;;  %s1212_s26 = smov 0  }
   0xa LB: > { %1503 = sst [smem:[#allocation11_spill]] %s1146_s23  ;;  %s916_s27 = sadd.s32 4294967295, %s1158_s26   ;;  %s1158_s26 = sphi %s1212_s26, %s25_s26   ;;  %s1154_s25 = sphi %s1210_s25, %s1521_s25   ;;  %s1150_s24 = sphi %s1208_s24, %s1520_s24   ;;  %s1146_s23 = sphi %s1206_s23, %s1516_s23   ;;  %s1142_s22 = sphi %s1204_s22, %s1519_s22   ;;  %s1138_s21 = sphi %s1202_s21, %s1518_s21  }
   0xb   : > { %s917_s28 = sadd.s32 4294967294, %s1158_s26   ;;  %s37_s29 = sadd.s32 1, %s1154_s25 }
   0xc   : > { %s46_s30 = sadd.s32 1, %s1146_s23  ;;  %p39_p0 = scmp.ge.s32.totalorder %s37_s29, 2 }
   0xd   : > { %p53_p1 = scmp.ne.s32.totalorder %s1146_s23, %s1142_s22  ;;  %p54_p2 = scmp.eq.s32.totalorder %s1158_s26, 0 }
   0xe   : > { %p59_p3 = scmp.ne.s32.totalorder %s1142_s22, %s1138_s21  ;;  %s1523_s29 = smov (%p39_p0, %s37_s29), 0 }
   0xf   : > { %1504 = sst [smem:[#allocation12_spill]] %s1523_s29  ;;  %p1243_p4 = por %p54_p2, %p53_p1 }
  0x10   : > { %p60_p5 = scmp.eq.s32.totalorder %s916_s27, 0  ;;  %s41_s8 = ssub.s32 %s1154_s25, %s1523_s29 }
  0x11   : > { %p225_p6 = scmp.eq.s32.totalorder %s916_s27, 1  ;;  %p44_p7 = scmp.eq.s32.totalorder %s41_s8, 0 }
  0x12   : > { %p1249_p8 = por %p60_p5, %p59_p3  ;;  %p231_p10 = scmp.eq.s32.totalorder %s917_s28, 1 }
  0x13   : > { %p1253_p9 = por %p225_p6, %p53_p1  ;;  %p964_p13 = scmp.lt.s32.totalorder %s1158_s26, 2 }
  0x14   : > { %s1258_s11 = scalar_select %p44_p7, %s1146_s23, %s46_s30  }
  0x15   : > { %p1260_p11 = por %p231_p10, %p59_p3  ;;  %s1267_s13 = sand.u32 1, %s1146_s23  }
  0x16   : > { %1508 = sst [smem:[#allocation13_spill]] %s1258_s11  ;;  %s1499_s14 = smul.u32 48, %s1267_s13 }
  0x17   : > { %s941_s15 = smul.u32 768, %s1154_s25  ;;  %p1273_p0 = pnand %p964_p13, %p1243_p4 }
  0x18   : > { %s1511_s0 = sld [smem:[#allocation14_spill]]  ;;  %s255_s20 = scalar_lea.vmem [#allocation2], %s1499_s14 }
  0x19   : > { %s264_s27 = sshll.u32 %s255_s20, 4  ;;  %p922_p1 = scmp.ge.s32.totalorder %s1158_s26, 1  ;;  %s265_s27 = int_to_ptr.vmem [resolvable:$true] %s264_s27 }
  0x1a   : > { %s252_s28 = scalar_lea.sflag [#allocation3], %s1267_s13  ;;  %p1020_p2 = pneg %p1273_p0 }
  0x1b   : > { %s1031_s30 = scalar_lea.vmem %s265_s27, 768  ;;  %s1160_s7 = smov [#allocation2]  }
  0x1c   : > { %p1032_p3 = scmp.ne.s32.totalorder %s265_s27, %s1031_s30  ;;  %s1036_s8 = sshll.u32 %s1160_s7, 4  ;;  %s1037_s8 = int_to_ptr.vmem [resolvable:$false] %s1036_s8 }
  0x1d   : > { %s1038_s17 = scalar_lea.vmem %s1037_s8, 1536  ;;  %p1039_p6 = scmp.lt.s32.totalorder %s265_s27, %s1037_s8 }
  0x1e   : > { %s263_s19 = scalar_lea.hbm %s1511_s0, %s941_s15  ;;  %p1034_p4 = pnand %p1032_p3, %p1020_p2 }
  0x1f   : > { %p1040_p7 = scmp.lt.s32.totalorder %s1038_s17, %s1031_s30 }
  0x20   : > { %p1035_p5 = pneg %p1034_p4 }
  0x21   : > { %p1041_p10 = por %p1040_p7, %p1039_p6 }
  0x23   : > { %p1042_p13 = pnand %p1041_p10, %p1035_p5 }
  0x25   : > { %1045 = shalt.err (!%p1042_p13)
}
  0x26   : > { %s1161_s18 = smov 128   ;;  %s1162_s20 = smov 8  }
  0x27   : > { %956 = dma.hbm_to_vmem [thread:$0]  (!%p1273_p0), %s263_s19, 768, %s265_s27, %s252_s28, %s1161_s18, %s1161_s18, %s1162_s20  }
  0x28   : > { %p335_p3 = scmp.lt.s32.totalorder %s1158_s26, 3  ;;  %s306_s30 = scalar_lea.hbm %s1495_s3, %s941_s15 }
  0x29   : > { %s1513_s17 = smul.u32 48, %s1267_s13  ;;  %s295_s11 = scalar_lea.sflag [#allocation6], %s1267_s13 }
  0x2a   : > { %p1301_p4 = pnand %p922_p1, %p335_p3  ;;  %s1163_s19 = smov [#allocation5]  }
  0x2b   : > { %s298_s0 = scalar_lea.vmem [#allocation5], %s1513_s17  ;;  %s1064_s27 = sshll.u32 %s1163_s19, 4  ;;  %s1065_s27 = int_to_ptr.vmem [resolvable:$false] %s1064_s27 }
  0x2c   : > { %s307_s29 = sshll.u32 %s298_s0, 4  ;;  %s1066_s14 = scalar_lea.vmem %s1065_s27, 1536  ;;  %s308_s29 = int_to_ptr.vmem [resolvable:$true] %s307_s29 }
  0x2d   : > { %s1059_s23 = scalar_lea.vmem %s308_s29, 768  ;;  %p1067_p10 = scmp.lt.s32.totalorder %s308_s29, %s1065_s27 }
  0x2e   : > { %p1060_p5 = scmp.ne.s32.totalorder %s308_s29, %s1059_s23  ;;  %p1068_p1 = scmp.lt.s32.totalorder %s1066_s14, %s1059_s23 }
  0x30   : > { %p1062_p6 = pnand %p1060_p5, %p1020_p2  ;;  %p1069_p13 = por %p1068_p1, %p1067_p10 }
  0x32   : > { %p1063_p7 = pneg %p1062_p6 }
  0x34   : > { %p1070_p3 = pnand %p1069_p13, %p1063_p7 }
  0x36   : > { %1073 = shalt.err (!%p1070_p3)
}
  0x37   : > { %959 = dma.hbm_to_vmem [thread:$0]  (!%p1273_p0), %s306_s30, 768, %s308_s29, %s295_s11, %s1161_s18, %s1161_s18, %s1162_s20  }
  0x38   : > { %339 = sbr.rel (%p1301_p4) target bundleno = 458 (0x1ca), region = 44  ;;  %s1316_s0 = sand.u32 (!%p1301_p4), 1, %s1142_s22  }
  0x39   : > { %s944_s13 = smul.u32 (!%p1301_p4), 48, %s1316_s0  ;;  %s342_s15 = scalar_lea.sflag (!%p1301_p4), [#allocation3], %s1316_s0 }
  0x3b   : > { %s345_s28 = scalar_lea.vmem (!%p1301_p4), [#allocation2], %s944_s13 }
  0x3d   : > { %1125 = dma.done.wait (%p1249_p8), %s342_s15, 768  }
  0x3e   : > { %1127 = vsyncadd (%p1249_p8), %s342_s15, 4294966528  ;;  %s351_s23 = scalar_lea.sflag [#allocation6], %s1316_s0  ;;  %s354_s29 = scalar_lea.vmem [#allocation5], %s944_s13 }
  0x3f   : > { %1129 = dma.done.wait (%p1249_p8), %s351_s23, 768  }
  0x40   : > { %1131 = vsyncadd (%p1249_p8), %s351_s23, 4294966528  ;;  %p417_p0 = scmp.lt.s32.totalorder %s1150_s24, 1  ;;  %v446_v0 = vld [vmem:[%s345_s28] sm:$0xff]  ;;  %v447_v1 = vld [vmem:[%s345_s28 + $0x8] sm:$0xff]  ;;  %vm459_vm0 = vcmask 124928   ;;  %vm477_vm1 = vcmask 1040384  }
  0x41   : > { %v928_v2 = vld [vmem:[%s345_s28 + $0x10] sm:$0xff]  ;;  %v929_v3 = vld [vmem:[%s345_s28 + $0x18] sm:$0xff]  ;;  %v930_v5 = vld [vmem:[%s345_s28 + $0x20] sm:$0xff]  ;;  %s1165_s23 = smov 127   ;;  %vm492_vm2 = vcmask 1046528   ;;  %vm504_vm3 = vcmask 1045504  }
  0x42   : > { %s418_s11 = scalar_select %p417_p0, %s1150_s24, 1  ;;  %v451_v4 = vadd.f32 %v928_v2, %v446_v0  ;;  %v931_v6 = vld [vmem:[%s345_s28 + $0x28] sm:$0xff]  ;;  %v452_v7 = vadd.f32 %v929_v3, %v447_v1  ;;  %v578_v8 = vld [vmem:[%s354_s29] sm:$0xff]  ;;  %v932_v10 = vld [vmem:[%s354_s29 + $0x10] sm:$0xff]  ;;  %vm522_vm4 = vcmask 7168   ;;  %vm531_vm5 = vcmask 121856  }
  0x43   : > { %v579_v9 = vld [vmem:[%s354_s29 + $0x8] sm:$0xff]  ;;  %v933_v12 = vld [vmem:[%s354_s29 + $0x18] sm:$0xff]  ;;  %v583_v13 = vadd.f32 %v932_v10, %v578_v8  ;;  %v934_v14 = vld [vmem:[%s354_s29 + $0x20] sm:$0xff]  ;;  %s1164_s28 = smov 1   ;;  %vm718_vm6 = vcmask 130048   ;;  %s937_s18 = sshll.u32 %s1150_s24, 7 }
  0x44   : > { %s1331_s16 = sshll.u32 %s418_s11, 2  ;;  %v456_v11 = vadd.f32 %v930_v5, %v451_v4  ;;  %v935_v15 = vld [vmem:[%s354_s29 + $0x28] sm:$0xff]  ;;  %v457_v16 = vadd.f32 %v931_v6, %v452_v7  ;;  %v584_v17 = vadd.f32 %v933_v12, %v579_v9  ;;  %s923_s29 = sshll.u32 %s1316_s0, 3 }
  0x45   : > { %s430_s7 = scalar_lea.vmem %s1494_s2, %s1331_s16  ;;  %s438_s8 = scalar_lea.vmem %s1496_s4, %s1331_s16  ;;  %v588_v22 = vadd.f32 %v934_v14, %v583_v13 }
  0x46   : > { %s423_s27 = scalar_lea.vmem %s1493_s1, %s1331_s16  ;;  %s445_s15 = scalar_lea.vmem %s1497_s5, %s1331_s16  ;;  %v467_v18 = vld [vmem:[%s430_s7] sm:$0x7]  ;;  %v478_v21 = vrot.slane %v456_v11, 7  ;;  %v479_v26 = vrot.slane %v457_v16, 7  ;;  %v589_v27 = vadd.f32 %v935_v15, %v584_v17 }
  0x47   : > { %v590_v19 = vld [vmem:[%s438_s8] sm:$0x7]  ;;  %v468_v23 = vsel %vm459_vm0, %v467_v18, 0.0  ;;  %v608_v30 = vrot.slane %v588_v22, 7  ;;  %s415_s11 = scalar_lea.vmem [#allocation7], %s923_s29  ;;  %s746_s30 = scalar_lea.hbm %s1498_s6, %s937_s18 }
  0x48   : > { %v458_v20 = vld [vmem:[%s423_s27] sm:$0x7]  ;;  %v591_v24 = vsel %vm459_vm0, %v590_v19, 0.0  ;;  %v469_v28 = vrot.slane %v468_v23, 4  ;;  %v1354_v33 = vsel %vm477_vm1, %v478_v21, %v479_v26  ;;  %v609_v34 = vrot.slane %v589_v27, 7  ;;  %s748_s16 = sshll.u32 %s415_s11, 4  ;;  %s1447_s16 = int_to_ptr.vmem [resolvable:$true] %s748_s16 }
  0x49   : > { %v598_v25 = vld [vmem:[%s445_s15] sm:$0x7]  ;;  %v592_v29 = vrot.slane %v591_v24, 4  ;;  %v460_v31 = vsel %vm459_vm0, %v458_v20, 0.0  ;;  %538 = vrot.lane.b32.xlu0 %v1354_v33, %s1164_s28  ;;  %553 = vrot.lane.b32.xlu1 %v1354_v33, %s1165_s23  ;;  %v1368_v56 = vmul.f32 2.0, %v1354_v33  ;;  %v506_v4 = vrot.slane %v1354_v33, 2 }
  0x4a   : > { %v599_v32 = vsel %vm459_vm0, %v598_v25, 0.0  ;;  %v470_v35 = vadd.f32 %v469_v28, %v468_v23  ;;  %v461_v37 = vrot.slane %v460_v31, 4  ;;  %v1361_v39 = vsel %vm477_vm1, %v608_v30, %v609_v34  ;;  %s734_s8 = scalar_lea.sflag [#allocation4], %s1316_s0  ;;  %s1074_s17 = scalar_lea.vmem %s1447_s16, 128 }
  0x4b   : > { %v593_v36 = vadd.f32 %v592_v29, %v591_v24  ;;  %v600_v38 = vrot.slane %v599_v32, 4  ;;  %v494_v0 = vrot.slane %v1368_v56, 1  ;;  %v1381_v1 = vmul.f32 2.0, %v1361_v39  ;;  %p1075_p8 = scmp.ne.s32.totalorder %s1447_s16, %s1074_s17  ;;  %s1166_s19 = smov [#allocation7]  }
  0x4c   : > { %v471_v40 = vrot.slane %v470_v35, 2  ;;  %v462_v42 = vadd.f32 %v461_v37, %v460_v31  ;;  %v634_v20 = vrot.slane %v1361_v39, 2  ;;  %s1078_s24 = sshll.u32 %s1166_s19, 4  ;;  %s1079_s24 = int_to_ptr.vmem [resolvable:$false] %s1078_s24 }
  0x4d   : > { %v594_v41 = vrot.slane %v593_v36, 2  ;;  %v601_v43 = vadd.f32 %v600_v38, %v599_v32  ;;  %664 = vrot.lane.b32.xlu0 %v1361_v39, %s1164_s28  ;;  %v623_v12 = vrot.slane %v1381_v1, 1  ;;  %p1076_p2 = pnand %p1075_p8, %p1253_p9  ;;  %s1080_s27 = scalar_lea.vmem %s1079_s24, 256 }
  0x4e   : > { %v472_v44 = vadd.f32 %v471_v40, %v470_v35  ;;  %v463_v46 = vrot.slane %v462_v42, 2  ;;  %p1081_p5 = scmp.lt.s32.totalorder %s1447_s16, %s1079_s24  ;;  %p1082_p6 = scmp.lt.s32.totalorder %s1080_s27, %s1074_s17 }
  0x4f   : > { %v595_v45 = vadd.f32 %v594_v41, %v593_v36  ;;  %v602_v47 = vrot.slane %v601_v43, 2  ;;  %p1077_p4 = pneg %p1076_p2 }
  0x50   : > { %v473_v48 = vrot.slane %v472_v44, 1  ;;  %v464_v50 = vadd.f32 %v463_v46, %v462_v42  ;;  %p1083_p7 = por %p1082_p6, %p1081_p5 }
  0x51   : > { %v596_v49 = vrot.slane %v595_v45, 1  ;;  %v603_v51 = vadd.f32 %v602_v47, %v601_v43  ;;  %679 = vrot.lane.b32.xlu0 %v1361_v39, %s1165_s23 }
  0x52   : > { %v474_v52 = vadd.f32 %v473_v48, %v472_v44  ;;  %v465_v54 = vrot.slane %v464_v50, 1  ;;  %p1084_p10 = pnand %p1083_p7, %p1077_p4 }
  0x53   : > { %v597_v53 = vadd.f32 %v596_v49, %v595_v45  ;;  %v604_v55 = vrot.slane %v603_v51, 1 }
  0x54   : > { %v485_v57 = vsel %vm477_vm1, %v479_v26, %v474_v52  ;;  %v466_v58 = vadd.f32 %v465_v54, %v464_v50 }
  0x55   : > { %540 = vrot.lane.b32.xlu1 %v485_v57, %s1164_s28  ;;  %v1372_v59 = vmul.f32 2.0, %v485_v57  ;;  %v614_v60 = vsel %vm477_vm1, %v597_v53, %v608_v30  ;;  %v605_v61 = vadd.f32 %v604_v55, %v603_v51  ;;  %v508_v13 = vrot.slane %v485_v57, 2 }
  0x56   : > { %v484_v62 = vsel %vm477_vm1, %v466_v58, %v478_v21  ;;  %v1383_v2 = vmul.f32 2.0, %v614_v60  ;;  %v633_v19 = vrot.slane %v614_v60, 2 }
  0x57   : > { %v1376_v63 = vmul.f32 2.0, %v484_v62  ;;  %536 = vrot.lane.b32.xlu0 %v484_v62, %s1164_s28  ;;  %v505_v3 = vrot.slane %v484_v62, 2  ;;  %v496_v5 = vrot.slane %v1372_v59, 1  ;;  %v615_v6 = vsel %vm477_vm1, %v609_v34, %v605_v61 }
  0x58   : > { %v622_v11 = vrot.slane %v1383_v2, 1  ;;  %v618_v14 = vmul.f32 2.0, %v615_v6  ;;  %v509_v22 = vsel %vm504_vm3, %v506_v4, %v508_v13  ;;  %v635_v25 = vsel %vm504_vm3, %v633_v19, %v634_v20 }
  0x59   : > { %662 = vrot.lane.b32.xlu1 %v614_v60, %s1164_s28  ;;  %v493_v7 = vrot.slane %v1376_v63, 1  ;;  %v507_v10 = vsel %vm504_vm3, %v505_v3, %v506_v4  ;;  %v497_v15 = vsel %vm492_vm2, %v494_v0, %v496_v5  ;;  %v636_v26 = vrot.slane %v615_v6, 2 }
  0x5a   : > { %v501_v17 = vadd.f32 %v497_v15, %v1354_v33  ;;  %v624_v18 = vsel %vm492_vm2, %v622_v11, %v623_v12  ;;  %v625_v21 = vrot.slane %v618_v14, 1 }
  0x5b   : > { %551 = vrot.lane.b32.xlu0 %v484_v62, %s1165_s23  ;;  %v495_v8 = vsel %vm492_vm2, %v493_v7, %v494_v0  ;;  %v629_v23 = vadd.f32 %v624_v18, %v614_v60  ;;  %v637_v30 = vsel %vm504_vm3, %v634_v20, %v636_v26 }
  0x5c   : > { %v500_v9 = vadd.f32 %v495_v8, %v484_v62  ;;  %v513_v24 = vadd.f32 %v509_v22, %v501_v17  ;;  %v626_v27 = vsel %vm492_vm2, %v623_v12, %v625_v21 }
  0x5d   : > { %666 = vrot.lane.b32.xlu1 %v615_v6, %s1164_s28  ;;  %v640_v28 = vadd.f32 %v635_v25, %v629_v23  ;;  %v630_v29 = vadd.f32 %v626_v27, %v1361_v39 }
  0x5e   : > { %v512_v16 = vadd.f32 %v507_v10, %v500_v9 }
  0x5f   : > { %555 = vrot.lane.b32.xlu0 %v485_v57, %s1165_s23  ;;  %v641_v31 = vadd.f32 %v637_v30, %v630_v29 }
  0x61   : > { %677 = vrot.lane.b32.xlu1 %v614_v60, %s1165_s23 }
  0x63   : > { %516 = vrot.lane.b32.xlu0 %v512_v16, %s1164_s28 }
  0x65   : > { %681 = vrot.lane.b32.xlu1 %v615_v6, %s1165_s23 }
  0x67   : > { %525 = vrot.lane.b32.xlu0 %v512_v16, %s1165_s23 }
  0x69   : > { %518 = vrot.lane.b32.xlu1 %v513_v24, %s1164_s28 }
  0x6b   : > { %644 = vrot.lane.b32.xlu0 %v640_v28, %s1164_s28 }
  0x6d   : > { %527 = vrot.lane.b32.xlu1 %v513_v24, %s1165_s23 }
  0x6f   : > { %652 = vrot.lane.b32.xlu0 %v640_v28, %s1165_s23 }
  0x71   : > { %646 = vrot.lane.b32.xlu1 %v641_v31, %s1164_s28 }
  0x75   : > { %654 = vrot.lane.b32.xlu1 %v641_v31, %s1165_s23 }
  0xbb   : > { %v539_v32 = vpop.permute.xlu0 %538  ;;  %v554_v33 = vpop.permute.xlu1 %553 }
  0xbc   : > { %v546_v46 = vsel %vm522_vm4, 0.0, %v539_v32  ;;  %v561_v60 = vsel %vm531_vm5, %v554_v33, 0.0 }
  0xbd   : > { %v549_v53 = vadd.f32 %v546_v46, %v1368_v56 }
  0xbf   : > { %v665_v34 = vpop.permute.xlu0 %664  ;;  %v564_v5 = vadd.f32 %v561_v60, %v549_v53 }
  0xc0   : > { %v672_v42 = vsel %vm522_vm4, 0.0, %v665_v34 }
  0xc1   : > { %v675_v49 = vadd.f32 %v672_v42, %v1381_v1  ;;  %v570_v13 = vrot.slane %v564_v5, 2 }
  0xc3   : > { %v680_v35 = vpop.permute.xlu0 %679 }
  0xc4   : > { %v687_v55 = vsel %vm531_vm5, %v680_v35, 0.0 }
  0xc7   : > { %v541_v36 = vpop.permute.xlu1 %540 }
  0xc8   : > { %v547_v54 = vsel %vm522_vm4, 0.0, %v541_v36 }
  0xc9   : > { %v537_v37 = vpop.permute.xlu0 %536 }
  0xca   : > { %v545_v44 = vsel %vm522_vm4, 0.0, %v537_v37 }
  0xcb   : > { %v663_v38 = vpop.permute.xlu1 %662  ;;  %v548_v51 = vadd.f32 %v545_v44, %v1376_v63  ;;  %v550_v63 = vadd.f32 %v547_v54, %v1372_v59 }
  0xcc   : > { %v671_v43 = vsel %vm522_vm4, 0.0, %v663_v38 }
  0xcd   : > { %v552_v39 = vpop.permute.xlu0 %551  ;;  %v674_v50 = vadd.f32 %v671_v43, %v1383_v2  ;;  %v690_v2 = vadd.f32 %v687_v55, %v675_v49 }
  0xce   : > { %v560_v57 = vsel %vm531_vm5, %v552_v39, 0.0 }
  0xcf   : > { %v667_v40 = vpop.permute.xlu1 %666  ;;  %v563_v3 = vadd.f32 %v560_v57, %v548_v51  ;;  %v696_v9 = vrot.slane %v690_v2, 2 }
  0xd0   : > { %v673_v47 = vsel %vm522_vm4, 0.0, %v667_v40 }
  0xd1   : > { %v556_v41 = vpop.permute.xlu0 %555  ;;  %v676_v61 = vadd.f32 %v673_v47, %v618_v14  ;;  %v569_v10 = vrot.slane %v563_v3, 2 }
  0xd2   : > { %v562_v1 = vsel %vm531_vm5, %v556_v41, 0.0 }
  0xd3   : > { %v678_v45 = vpop.permute.xlu1 %677  ;;  %v565_v8 = vadd.f32 %v562_v1, %v550_v63  ;;  %v571_v19 = vsel %vm504_vm3, %v569_v10, %v570_v13 }
  0xd4   : > { %v686_v48 = vsel %vm531_vm5, %v678_v45, 0.0  ;;  %v576_v29 = vsub.f32 %v563_v3, %v571_v19 }
  0xd5   : > { %v517_v52 = vpop.permute.xlu0 %516  ;;  %v689_v62 = vadd.f32 %v686_v48, %v674_v50  ;;  %v572_v16 = vrot.slane %v565_v8, 2 }
  0xd6   : > { %v523_v17 = vsel %vm522_vm4, 0.0, %v517_v52  ;;  %v710_v40 = vand.u32 2147483647, %v576_v29 }
  0xd7   : > { %v682_v58 = vpop.permute.xlu1 %681  ;;  %v695_v7 = vrot.slane %v689_v62, 2  ;;  %v573_v26 = vsel %vm504_vm3, %v570_v13, %v572_v16 }
  0xd8   : > { %v688_v0 = vsel %vm531_vm5, %v682_v58, 0.0  ;;  %v577_v34 = vsub.f32 %v564_v5, %v573_v26 }
  0xd9   : > { %v691_v56 = vadd.f32 %v688_v0, %v676_v61  ;;  %v526_v4 = vpop.permute.xlu0 %525  ;;  %v697_v15 = vsel %vm504_vm3, %v695_v7, %v696_v9 }
  0xda   : > { %v532_v59 = vsel %vm531_vm5, %v526_v4, 0.0  ;;  %v702_v22 = vsub.f32 %v689_v62, %v697_v15  ;;  %v711_v45 = vand.u32 2147483647, %v577_v34 }
  0xdb   : > { %v519_v6 = vpop.permute.xlu1 %518  ;;  %v698_v11 = vrot.slane %v691_v56, 2  ;;  %v534_v23 = vsub.f32 %v523_v17, %v532_v59 }
  0xdc   : > { %v524_v31 = vsel %vm522_vm4, 0.0, %v519_v6  ;;  %v712_v33 = vand.u32 2147483647, %v702_v22 }
  0xdd   : > { %v645_v12 = vpop.permute.xlu0 %644  ;;  %v699_v20 = vsel %vm504_vm3, %v696_v9, %v698_v11  ;;  %v704_v35 = vand.u32 2147483647, %v534_v23 }
  0xde   : > { %v650_v18 = vsel %vm522_vm4, 0.0, %v645_v12  ;;  %v703_v30 = vsub.f32 %v690_v2, %v699_v20  ;;  %v714_v44 = vmul.f32 %v712_v33, %v710_v40 }
  0xdf   : > { %v528_v14 = vpop.permute.xlu1 %527 }
  0xe0   : > { %v533_v27 = vsel %vm531_vm5, %v528_v14, 0.0  ;;  %v713_v41 = vand.u32 2147483647, %v703_v30 }
  0xe1   : > { %v653_v21 = vpop.permute.xlu0 %652  ;;  %v535_v36 = vsub.f32 %v524_v31, %v533_v27 }
  0xe2   : > { %v658_v25 = vsel %vm531_vm5, %v653_v21, 0.0  ;;  %v715_v49 = vmul.f32 %v713_v41, %v711_v45 }
  0xe3   : > { %v647_v24 = vpop.permute.xlu1 %646  ;;  %v660_v28 = vsub.f32 %v650_v18, %v658_v25  ;;  %v705_v46 = vand.u32 2147483647, %v535_v36 }
  0xe4   : > { %v651_v38 = vsel %vm522_vm4, 0.0, %v647_v24 }
  0xe5   : > { %v706_v32 = vand.u32 2147483647, %v660_v28 }
  0xe7   : > { %v655_v37 = vpop.permute.xlu1 %654  ;;  %v708_v42 = vmul.f32 %v706_v32, %v704_v35 }
  0xe8   : > { %v659_v39 = vsel %vm531_vm5, %v655_v37, 0.0 }
  0xe9   : > { %v661_v43 = vsub.f32 %v651_v38, %v659_v39  ;;  %v716_v50 = vadd.f32 %v714_v44, %v708_v42 }
  0xeb   : > { %v707_v47 = vand.u32 2147483647, %v661_v43  ;;  %v719_v52 = vsel %vm718_vm6, %v716_v50, 0.0 }
  0xed   : > { %v709_v48 = vmul.f32 %v707_v47, %v705_v46 }
  0xef   : > { %v717_v51 = vadd.f32 %v715_v49, %v709_v48 }
  0xf1   : > { %v720_v53 = vsel %vm718_vm6, %v717_v51, 0.0 }
  0xf2   : > { %v721_v54 = vadd.f32 %v720_v53, %v719_v52 }
  0xf4   : > { %722 = vadd.xlane.f32.xlu0 %v721_v54 }
 0x17d   : > { %v723_v55 = vpop.xlane.xlu0 %722 }
 0x17e   : > { %v724_v57 = vrot.slane %v723_v55, 4 }
 0x180   : > { %v725_v58 = vadd.f32 %v724_v57, %v723_v55 }
 0x182   : > { %v726_v60 = vrot.slane %v725_v58, 2 }
 0x184   : > { %v727_v61 = vadd.f32 %v726_v60, %v725_v58 }
 0x186   : > { %v728_v62 = vrot.slane %v727_v61, 1 }
 0x188   : > { %v729_v0 = vadd.f32 %v728_v62, %v727_v61 }
 0x18a   : > { %945 = vpush %v729_v0 }
 0x1bb   : > { %s946_s20 = spop %945 }
 0x1bc   : > { %v731_v1 = vstv %s946_s20 }
 0x1bd   : > { %732 = vst [vmem:[%s415_s11] sm:$0xff] %v731_v1 }
 0x1be   : > { %1087 = shalt.err (!%p1084_p10)
}
 0x1bf   : > { %s1088_s14 = scalar_lea.hbm %s746_s30, 128  ;;  %s1092_s15 = scalar_lea.hbm %s1498_s6, 256 }
 0x1c0   : > { %p1089_p1 = scmp.ne.s32.totalorder %s746_s30, %s1088_s14  ;;  %p1093_p0 = scmp.lt.s32.totalorder %s746_s30, %s1498_s6 }
 0x1c1   : > { %p1094_p8 = scmp.lt.s32.totalorder %s1092_s15, %s1088_s14 }
 0x1c2   : > { %p1090_p13 = pnand %p1089_p1, %p1253_p9 }
 0x1c3   : > { %p1095_p2 = por %p1094_p8, %p1093_p0 }
 0x1c4   : > { %p1091_p3 = pneg %p1090_p13 }
 0x1c6   : > { %p1096_p12 = pnand %p1095_p2, %p1091_p3 }
 0x1c8   : > { %1099 = shalt.err (!%p1096_p12)
}
 0x1c9   : > { %951 = dma.vmem_to_hbm [thread:$0]  (%p1253_p9), %s1447_s16, 128, %s746_s30, %s734_s8  }
 0x1ca PF: > { %s760_s29 = sand.u32 1, %s1138_s21   ;;  %p1514_p4 = scmp.ge.s32.totalorder %s1158_s26, 2 }
 0x1cb   : > { %s761_s11 = scalar_lea.sflag [#allocation4], %s760_s29 }
 0x1cc   : > { %p961_p5 = pnand %p1514_p4, %p1260_p11 }
 0x1ce   : > { %p962_p6 = pneg %p961_p5 }
 0x1d0   : > { %1133 = dma.done.wait (%p962_p6), %s761_s11, 128  }
 0x1d1   : > { %1135 = vsyncadd (%p962_p6), %s761_s11, 4294967168  ;;  %s25_s26 = sadd.s32 1, %s1158_s26   ;;  %s1515_s18 = sld [smem:[#allocation11_spill]] }
 0x1d2   : > { %p22_p7 = scmp.ge.s32.totalorder %s25_s26, 4   ;;  %s1516_s23 = sld [smem:[#allocation13_spill]] }
 0x1d3   : > { %s1517_s10 = sld [smem:[#allocation12_spill]]  ;;  %s1518_s21 = smov %s1142_s22 }
 0x1d4   : > { %s1520_s24 = smov %s1154_s25 }
 0x1d5   :  { %24 = sbr.rel (!%p22_p7) target bundleno = 10 (0xa), region = 118 }
 0x1d7   : > { %s1519_s22 = smov %s1515_s18 }
 0x1d9   : > { %s1521_s25 = smov %s1517_s10 }
 0x1da   :  { %766 = vsyncpa [#allocation3], 1 }
 0x1db   :  { %768 = vsyncpa [#allocation3 + $0x1], 1 }
 0x1dc   :  { %769 = vsyncpa [#allocation6], 1 }
 0x1dd   :  { %771 = vsyncpa [#allocation6 + $0x1], 1 }
 0x1de   :  { %772 = vsyncpa [#allocation4], 1 }
 0x1df   :  { %774 = vsyncpa [#allocation4 + $0x1], 1 }

</bundles_post_ra>
